<compile_context>
chip_gen: v6e
topology: v6e:2x2x1
jax: 0.10.0
libtpu: 0.0.40
codegen_flags: <defaults>
</compile_context>

<pallas_src>
import functools

import jax
import jax.numpy as jnp
import numpy as np
from jax import lax
from jax.experimental import pallas as pl
from jax.experimental.pallas import tpu as pltpu


def _attention_kernel(x_ref, w_qkv_ref, w_out_ref, b_out_ref, o_ref, *, heads):
    """One batch element of fused multi-head attention (all heads batched)."""
    x = x_ref[0]                     # (N, D) bf16
    w_qkv = w_qkv_ref[...]           # (3H, D, dh) bf16, softmax scale folded into Q slabs
    w_out = w_out_ref[...]           # (H, dh, Dp) bf16, Dp = D padded to a 128-multiple
    b_out = b_out_ref[...]           # (1, Dp) f32, zero-padded

    # --- QKV projection, directly in per-head (g, N, dh) layout -------------
    # One batched matmul with x broadcast along the 3H axis: q/k/v land in
    # head-major layout, so no 16-lane column slices / transposes are needed.
    x_b = jnp.broadcast_to(x[None], (3 * heads,) + x.shape)             # (3H, N, D)
    qkv = lax.dot_general(x_b, w_qkv, (((2,), (1,)), ((0,), (0,))),
                          preferred_element_type=jnp.float32)           # (3H, N, dh) f32
    qkv = qkv.astype(jnp.bfloat16)   # single downcast (review #2)

    q = qkv[0 * heads:1 * heads]     # (H, N, dh), pre-scaled (leading-dim slice: cheap)
    k = qkv[1 * heads:2 * heads]     # (H, N, dh)
    v = qkv[2 * heads:3 * heads]     # (H, N, dh)

    # --- Attention, all heads in one batched dot_general ---------------------
    # scores: 'hnd,hmd->hnm' -- contract last dims, no explicit k transpose.
    s = lax.dot_general(q, k, (((2,), (2,)), ((0,), (0,))),
                        preferred_element_type=jnp.float32)             # (H, N, N) f32

    # Numerically-stable softmax; normalization deferred past the V matmul.
    s = s - jnp.max(s, axis=-1, keepdims=True)
    e = jnp.exp(s)                                                       # (H, N, N) f32
    denom = jnp.sum(e, axis=-1, keepdims=True)                           # (H, N, 1)

    # 'hnm,hmd->hnd'
    o = lax.dot_general(e.astype(jnp.bfloat16), v, (((2,), (1,)), ((0,), (0,))),
                        preferred_element_type=jnp.float32)              # (H, N, dh) f32
    o = o * pl.reciprocal(denom, approx=True)                            # EUP reciprocal

    # --- Output projection: 'hnd,hdD->hnD', then VPU sum over heads ----------
    out_h = lax.dot_general(o.astype(jnp.bfloat16), w_out,
                            (((2,), (1,)), ((0,), (0,))),
                            preferred_element_type=jnp.float32)          # (H, N, Dp) f32
    out = jnp.sum(out_h, axis=0) + b_out                                 # (N, Dp) f32

    # Lane-dense store: Dp is a multiple of 128 -> unmasked full-tile vst.
    o_ref[0] = out.astype(o_ref.dtype)


@functools.partial(jax.jit, static_argnames=("heads", "dim_head"))
def attention_pallas(x, w_qkv, w_out, b_out, *, heads, dim_head):
    """x: (B, N, D); w_qkv: (3*H*dh, D); w_out: (D, H*dh); b_out: (D,)."""
    B, N, D = x.shape
    scale = float(dim_head) ** -0.5
    # Output feature dim padded to a lane multiple so the kernel store is a full
    # unmasked (8,128)-tile write (review #1).  No-op when D % 128 == 0.
    d_pad = ((D + 127) // 128) * 128

    # --- Weight packing (done once, under jit, outside the kernel hot path) ---
    # to_qkv: PyTorch Linear weight (3*inner, D), rows ordered (qkv, h, dh).
    # Repack to head-major (3H, D, dh); fold the softmax scale into the Q slabs.
    w_qkv_h = w_qkv.reshape(3, heads, dim_head, D).transpose(0, 1, 3, 2)
    w_qkv_h = w_qkv_h.reshape(3 * heads, D, dim_head)
    g_scale = jnp.concatenate([
        jnp.full((heads, 1, 1), scale, dtype=w_qkv_h.dtype),
        jnp.ones((2 * heads, 1, 1), dtype=w_qkv_h.dtype)])
    w_qkv_h = (w_qkv_h * g_scale).astype(jnp.bfloat16)

    # to_out: PyTorch Linear weight (D, inner) -> (H, dh, Dp) with zero-padded
    # output columns; bias -> (1, Dp) zero-padded, kept in f32.
    w_out_h = jnp.transpose(w_out).reshape(heads, dim_head, D)
    w_out_h = jnp.pad(w_out_h, ((0, 0), (0, 0), (0, d_pad - D))).astype(jnp.bfloat16)
    b_out_p = jnp.pad(b_out, (0, d_pad - D)).reshape(1, d_pad).astype(jnp.float32)

    x_bf16 = x.astype(jnp.bfloat16)

    kernel = functools.partial(_attention_kernel, heads=heads)

    out_padded = pl.pallas_call(
        kernel,
        out_shape=jax.ShapeDtypeStruct((B, N, d_pad), x.dtype),
        grid_spec=pltpu.PrefetchScalarGridSpec(
            num_scalar_prefetch=0,
            grid=(B,),
            in_specs=[
                # Per-batch activation tile (pipelined, double-buffered).
                pl.BlockSpec((1, N, D), lambda b: (b, 0, 0)),
                # Grid-invariant weights/bias: VMEM-resident, single-buffered.
                pl.BlockSpec((3 * heads, D, dim_head), lambda b: (0, 0, 0),
                             pipeline_mode=pl.Buffered(1)),
                pl.BlockSpec((heads, dim_head, d_pad), lambda b: (0, 0, 0),
                             pipeline_mode=pl.Buffered(1)),
                pl.BlockSpec((1, d_pad), lambda b: (0, 0),
                             pipeline_mode=pl.Buffered(1)),
            ],
            out_specs=pl.BlockSpec((1, N, d_pad), lambda b: (b, 0, 0)),
        ),
        compiler_params=pltpu.CompilerParams(
            dimension_semantics=("parallel",),
            # Explicit VMEM budget (v5e default scoped VMEM is only 16 MiB).
            vmem_limit_bytes=32 * 1024 * 1024,
        ),
    )(x_bf16, w_qkv_h, w_out_h, b_out_p)

    # Drop the zero-padded output columns (XLA-level slice, outside the kernel).
    return out_padded[:, :, :D]


def attention_reference(x, w_qkv, w_out, b_out, *, heads, dim_head):
    """Pure-JAX f32 reference mirroring the PyTorch forward exactly."""
    B, N, _ = x.shape
    qkv = x @ w_qkv.T
    q, k, v = jnp.split(qkv, 3, axis=-1)

    def split_heads(t):
        return t.reshape(B, N, heads, dim_head).transpose(0, 2, 1, 3)

    q, k, v = map(split_heads, (q, k, v))
    dots = jnp.einsum('bhnd,bhmd->bhnm', q, k) * (float(dim_head) ** -0.5)
    attn = jax.nn.softmax(dots, axis=-1)
    out = jnp.einsum('bhnm,bhmd->bhnd', attn, v)
    out = out.transpose(0, 2, 1, 3).reshape(B, N, heads * dim_head)
    return out @ w_out.T + b_out


if __name__ == "__main__":
    # Small shapes consistent with the module's forward: x of shape (b, n, dim).
    B, N, DIM = 2, 8, 32
    HEADS, DIM_HEAD = 4, 16
    INNER = HEADS * DIM_HEAD

    key = jax.random.PRNGKey(0)
    kx, kqkv, kwo, kbo = jax.random.split(key, 4)

    x = jax.random.normal(kx, (B, N, DIM), dtype=jnp.float32)
    # Deterministic synthetic parameters (PyTorch Linear weight layout: (out, in)).
    w_qkv = jax.random.normal(kqkv, (3 * INNER, DIM), dtype=jnp.float32) * 0.05
    w_out = jax.random.normal(kwo, (DIM, INNER), dtype=jnp.float32) * 0.05
    b_out = jax.random.normal(kbo, (DIM,), dtype=jnp.float32) * 0.05

    out = attention_pallas(x, w_qkv, w_out, b_out, heads=HEADS, dim_head=DIM_HEAD)
    out = jax.block_until_ready(out)

    ref = attention_reference(x, w_qkv, w_out, b_out, heads=HEADS, dim_head=DIM_HEAD)
    # Tolerance loosened vs an f32 version: matmul operands are bf16 (f32 MXU
    # accumulation) and the softmax denominator uses the approx EUP reciprocal.
    np.testing.assert_allclose(np.asarray(out), np.asarray(ref), rtol=3e-2, atol=3e-2)

    print("KERNEL_OK")
</pallas_src>

<mosaic_0001>
module attributes {stable_mosaic.version = 11 : i64} {
  func.func @_attention_kernel(%arg0: i32, %arg1: memref<1x8x32xbf16, #tpu.memory_space<vmem>>, %arg2: memref<12x32x16xbf16, #tpu.memory_space<vmem>>, %arg3: memref<4x16x128xbf16, #tpu.memory_space<vmem>>, %arg4: memref<1x128xf32, #tpu.memory_space<vmem>>, %arg5: memref<1x8x128xf32, #tpu.memory_space<vmem>>) attributes {dimension_semantics = [#tpu.dimension_semantics<parallel>], iteration_bounds = array<i64: 2>, scalar_prefetch = 0 : i64, scratch_operands = 0 : i64, tpu.core_type = #tpu.core_type<tc>, window_params = [{transform_indices = @transform_0, window_bounds = array<i64: 1, 8, 32>}, {pipeline_mode = #tpu.pipeline_mode<synchronous>, transform_indices = @transform_1, window_bounds = array<i64: 12, 32, 16>}, {pipeline_mode = #tpu.pipeline_mode<synchronous>, transform_indices = @transform_2, window_bounds = array<i64: 4, 16, 128>}, {pipeline_mode = #tpu.pipeline_mode<synchronous>, transform_indices = @transform_3, window_bounds = array<i64: 1, 128>}, {transform_indices = @transform_4, window_bounds = array<i64: 1, 8, 128>}]} {
    %c0 = arith.constant 0 : index
    %c0_0 = arith.constant 0 : index
    %c0_1 = arith.constant 0 : index
    %0 = vector.load %arg1[%c0, %c0_0, %c0_1] : memref<1x8x32xbf16, #tpu.memory_space<vmem>>, vector<1x8x32xbf16>
    %1 = vector.shape_cast %0 : vector<1x8x32xbf16> to vector<8x32xbf16>
    %c0_2 = arith.constant 0 : index
    %c0_3 = arith.constant 0 : index
    %c0_4 = arith.constant 0 : index
    %2 = vector.load %arg2[%c0_2, %c0_3, %c0_4] : memref<12x32x16xbf16, #tpu.memory_space<vmem>>, vector<12x32x16xbf16>
    %c0_5 = arith.constant 0 : index
    %c0_6 = arith.constant 0 : index
    %c0_7 = arith.constant 0 : index
    %3 = vector.load %arg3[%c0_5, %c0_6, %c0_7] : memref<4x16x128xbf16, #tpu.memory_space<vmem>>, vector<4x16x128xbf16>
    %c0_8 = arith.constant 0 : index
    %c0_9 = arith.constant 0 : index
    %4 = vector.load %arg4[%c0_8, %c0_9] : memref<1x128xf32, #tpu.memory_space<vmem>>, vector<1x128xf32>
    %5 = vector.shape_cast %1 : vector<8x32xbf16> to vector<1x8x32xbf16>
    %6 = vector.shape_cast %5 : vector<1x8x32xbf16> to vector<1x8x32xbf16>
    %7 = vector.broadcast %6 : vector<1x8x32xbf16> to vector<12x8x32xbf16>
    %cst = arith.constant dense<0.000000e+00> : vector<12x8x16xf32>
    %8 = tpu.matmul %7, %2, %cst {dimension_numbers = #tpu.dot_dimension_numbers<[2], [1], [1], [2], [0, 0, 0, 1, 1, 2], [0], [0]>} : vector<12x8x32xbf16>, vector<12x32x16xbf16>, vector<12x8x16xf32> -> vector<12x8x16xf32>
    %9 = arith.truncf %8 : vector<12x8x16xf32> to vector<12x8x16xbf16>
    %10 = vector.extract_strided_slice %9 {offsets = [0, 0, 0], sizes = [4, 8, 16], strides = [1, 1, 1]} : vector<12x8x16xbf16> to vector<4x8x16xbf16>
    %11 = vector.extract_strided_slice %9 {offsets = [4, 0, 0], sizes = [4, 8, 16], strides = [1, 1, 1]} : vector<12x8x16xbf16> to vector<4x8x16xbf16>
    %12 = vector.extract_strided_slice %9 {offsets = [8, 0, 0], sizes = [4, 8, 16], strides = [1, 1, 1]} : vector<12x8x16xbf16> to vector<4x8x16xbf16>
    %cst_10 = arith.constant dense<0.000000e+00> : vector<4x8x8xf32>
    %13 = tpu.matmul %10, %11, %cst_10 {dimension_numbers = #tpu.dot_dimension_numbers<[2], [2], [1], [1], [0, 0, 0, 1, 1, 1], [0], [0]>} : vector<4x8x16xbf16>, vector<4x8x16xbf16>, vector<4x8x8xf32> -> vector<4x8x8xf32>
    %cst_11 = arith.constant dense<0xFF800000> : vector<4x8xf32>
    %14 = vector.multi_reduction <maximumf>, %13, %cst_11 [2] : vector<4x8x8xf32> to vector<4x8xf32>
    %15 = vector.shape_cast %14 : vector<4x8xf32> to vector<4x8x1xf32>
    %16 = vector.broadcast %15 : vector<4x8x1xf32> to vector<4x8x8xf32>
    %17 = arith.subf %13, %16 : vector<4x8x8xf32>
    %18 = math.exp %17 : vector<4x8x8xf32>
    %cst_12 = arith.constant dense<0.000000e+00> : vector<4x8xf32>
    %19 = vector.multi_reduction <add>, %18, %cst_12 [2] : vector<4x8x8xf32> to vector<4x8xf32>
    %20 = vector.shape_cast %19 : vector<4x8xf32> to vector<4x8x1xf32>
    %21 = arith.truncf %18 : vector<4x8x8xf32> to vector<4x8x8xbf16>
    %cst_13 = arith.constant dense<0.000000e+00> : vector<4x8x16xf32>
    %22 = tpu.matmul %21, %12, %cst_13 {dimension_numbers = #tpu.dot_dimension_numbers<[2], [1], [1], [2], [0, 0, 0, 1, 1, 2], [0], [0]>} : vector<4x8x8xbf16>, vector<4x8x16xbf16>, vector<4x8x16xf32> -> vector<4x8x16xf32>
    %23 = tpu.reciprocal %20 {approx = true} : vector<4x8x1xf32> -> vector<4x8x1xf32>
    %24 = vector.broadcast %23 : vector<4x8x1xf32> to vector<4x8x16xf32>
    %25 = arith.mulf %22, %24 : vector<4x8x16xf32>
    %26 = arith.truncf %25 : vector<4x8x16xf32> to vector<4x8x16xbf16>
    %cst_14 = arith.constant dense<0.000000e+00> : vector<4x8x128xf32>
    %27 = tpu.matmul %26, %3, %cst_14 {dimension_numbers = #tpu.dot_dimension_numbers<[2], [1], [1], [2], [0, 0, 0, 1, 1, 2], [0], [0]>} : vector<4x8x16xbf16>, vector<4x16x128xbf16>, vector<4x8x128xf32> -> vector<4x8x128xf32>
    %cst_15 = arith.constant dense<0.000000e+00> : vector<8x128xf32>
    %28 = vector.multi_reduction <add>, %27, %cst_15 [0] : vector<4x8x128xf32> to vector<8x128xf32>
    %29 = vector.broadcast %4 : vector<1x128xf32> to vector<8x128xf32>
    %30 = arith.addf %28, %29 : vector<8x128xf32>
    %c0_16 = arith.constant 0 : index
    %c0_17 = arith.constant 0 : index
    %c0_18 = arith.constant 0 : index
    %31 = vector.load %arg5[%c0_16, %c0_17, %c0_18] : memref<1x8x128xf32, #tpu.memory_space<vmem>>, vector<1x8x128xf32>
    %32 = vector.shape_cast %31 : vector<1x8x128xf32> to vector<8x128xf32>
    %33 = vector.shape_cast %30 : vector<8x128xf32> to vector<1x8x128xf32>
    tpu.vector_store %arg5[%c0_16, %c0_17, %c0_18], %33 {strides = array<i32>} : memref<1x8x128xf32, #tpu.memory_space<vmem>>, vector<1x8x128xf32>,
    return
  }
  func.func @transform_0(%arg0: i32) -> (i32, i32, i32) {
    %c0_i32 = arith.constant 0 : i32
    %c0_i32_0 = arith.constant 0 : i32
    %c0_i32_1 = arith.constant 0 : i32
    return %arg0, %c0_i32, %c0_i32_0 : i32, i32, i32
  }
  func.func @transform_1(%arg0: i32) -> (i32, i32, i32) {
    %c0_i32 = arith.constant 0 : i32
    %c0_i32_0 = arith.constant 0 : i32
    %c0_i32_1 = arith.constant 0 : i32
    %c0_i32_2 = arith.constant 0 : i32
    return %c0_i32, %c0_i32_0, %c0_i32_1 : i32, i32, i32
  }
  func.func @transform_2(%arg0: i32) -> (i32, i32, i32) {
    %c0_i32 = arith.constant 0 : i32
    %c0_i32_0 = arith.constant 0 : i32
    %c0_i32_1 = arith.constant 0 : i32
    %c0_i32_2 = arith.constant 0 : i32
    return %c0_i32, %c0_i32_0, %c0_i32_1 : i32, i32, i32
  }
  func.func @transform_3(%arg0: i32) -> (i32, i32) {
    %c0_i32 = arith.constant 0 : i32
    %c0_i32_0 = arith.constant 0 : i32
    %c0_i32_1 = arith.constant 0 : i32
    return %c0_i32, %c0_i32_0 : i32, i32
  }
  func.func @transform_4(%arg0: i32) -> (i32, i32, i32) {
    %c0_i32 = arith.constant 0 : i32
    %c0_i32_0 = arith.constant 0 : i32
    %c0_i32_1 = arith.constant 0 : i32
    return %arg0, %c0_i32, %c0_i32_0 : i32, i32, i32
  }
}

</mosaic_0001>

<bundles_post_ra>
// kernel: attention_pallas.1
= control target key start
LH: loop header
LB: loop body
LE: loop exit
PB: predicated region body
PF: predicated region fallthrough
CT: control target
= control target key end

     0   :  { %9 = vsyncpa [#allocation3], 0  ;;  %s2385_s0 = inlined_call_operand.vmem [shape: bf16[2,8,32], index: 0, kind: input, shape index: {}]   ;;  %s2386_s1 = inlined_call_operand.vmem [shape: bf16[12,32,16], index: 1, kind: input, shape index: {}]   ;;  %s2387_s2 = inlined_call_operand.vmem [shape: bf16[4,16,128], index: 2, kind: input, shape index: {}]   ;;  %s2388_s3 = inlined_call_operand.vmem [shape: f32[1,128], index: 3, kind: input, shape index: {}]   ;;  %s2389_s4 = inlined_call_operand.hbm [shape: f32[2,8,128], index: 4, kind: output, shape index: {}]  }
   0x1   :  { %11 = vsyncpa [#allocation3 + $0x1], 0  ;;  %s2061_s15 = smov 0   ;;  %s2063_s16 = smov 0  }
   0x2   :  { %s2065_s17 = smov 0   ;;  %s2067_s18 = smov 0  }
   0x3 LB: > { %s2082_s19 = sadd.s32 4294967295, %s2031_s18   ;;  %s1595_s20 = sadd.s32 4294967294, %s2031_s18   ;;  %s2031_s18 = sphi %s2067_s18, %s2395_s18   ;;  %s2027_s17 = sphi %s2065_s17, %s2394_s17   ;;  %s2023_s16 = sphi %s2063_s16, %s2393_s16   ;;  %s2019_s15 = sphi %s2061_s15, %s2392_s15  }
   0x4   : > { %s2086_s21 = sadd.s32 1, %s2031_s18   ;;  %s113_s22 = sadd.s32 1, %s2027_s17 }
   0x5   : > { %s110_s23 = ssub.s32 %s2031_s18, %s2086_s21  ;;  %p123_p0 = scmp.ne.s32.totalorder %s2027_s17, %s2023_s16 }
   0x6   : > { %p111_p1 = scmp.eq.s32.totalorder %s110_s23, 0  ;;  %p124_p2 = scmp.eq.s32.totalorder %s2082_s19, 1 }
   0x7   : > { %p129_p3 = scmp.ne.s32.totalorder %s2023_s16, %s2019_s15  ;;  %p130_p4 = scmp.eq.s32.totalorder %s1595_s20, 1 }
   0x8   : > { %s2097_s24 = scalar_select %p111_p1, %s2027_s17, %s113_s22  }
   0x9   : > { %p2099_p5 = por %p124_p2, %p123_p0  ;;  %p2103_p6 = por %p130_p4, %p129_p3 }
   0xa   : > { %p1598_p7 = scmp.ge.s32.totalorder %s2031_s18, 1  ;;  %p164_p8 = scmp.lt.s32.totalorder %s2031_s18, 3 }
   0xc   : > { %p165_p9 = pnand %p1598_p7, %p164_p8 }
   0xd   : > { %p189_p10 = scmp.lt.s32.totalorder (!%p165_p9), %s2082_s19, 1  ;;  %s186_s11 = sand.u32 (!%p165_p9), 1, %s2023_s16  }
   0xe   : > { %168 = sbr.rel (%p165_p9) target bundleno = 1019 (0x3fb), region = 36  ;;  %s1599_s12 = sshll.u32 (!%p165_p9), %s186_s11, 3 }
   0xf   : > { %s188_s22 = scalar_lea.vmem (!%p165_p9), [#allocation2], %s1599_s12  ;;  %s2035_s5 = smov (!%p165_p9), [#allocation2]  }
  0x10   : > { %s1536_s23 = sshll.u32 (!%p165_p9), %s188_s22, 4  ;;  %s1975_s6 = sshll.u32 (!%p165_p9), %s2035_s5, 4  ;;  %s2346_s23 = int_to_ptr.vmem [resolvable:$true] %s1536_s23  ;;  %s1976_s6 = int_to_ptr.vmem [resolvable:$false] %s1975_s6 }
  0x11   : > { %s1971_s30 = scalar_lea.vmem (!%p165_p9), %s2346_s23, 128  ;;  %s1977_s7 = scalar_lea.vmem (!%p165_p9), %s1976_s6, 256 }
  0x12   : > { %p1972_p11 = scmp.ne.s32.totalorder (!%p165_p9), %s2346_s23, %s1971_s30  ;;  %p1978_p0 = scmp.lt.s32.totalorder (!%p165_p9), %s2346_s23, %s1976_s6 }
  0x13   : > { %v1927_v0 = vld [vmem:[%s2386_s1 + $0x8] sm:$0xff]   ;;  %v2033_v1 = vmov 0.0   ;;  %v1928_v2 = vld [vmem:[%s2386_s1 + $0x18] sm:$0xff]   ;;  %v1929_v3 = vld [vmem:[%s2386_s1] sm:$0xff]   ;;  %vm2034_vm0 = vmmov 0   ;;  %s190_s9 = scalar_select %p189_p10, %s2082_s19, 1 }
  0x14   : > { %1718 = vmatprep.subr.bf16.mxu0 %v2033_v1  ;;  %1726 = vmatprep.subr.bf16.mxu1 %v2033_v1  ;;  %v1930_v4 = vld [vmem:[%s2386_s1 + $0x10] sm:$0xff]   ;;  %vm264_vm1 = vcmask 261120   ;;  %v1931_v5 = vld [vmem:[%s2386_s1 + $0x28] sm:$0xff]   ;;  %v1932_v6 = vld [vmem:[%s2386_s1 + $0x38] sm:$0xff]   ;;  %vm892_vm2 = vcmask 130048   ;;  %vm1121_vm3 = vcmask 1043456   ;;  %p1973_p12 = pnand %p1972_p11, %p2099_p5  ;;  %p1979_p1 = scmp.lt.s32.totalorder %s1977_s7, %s1971_s30 }
  0x15   : > { %1719 = vmatpush3.bf16.msra.mxu0 %v1927_v0  ;;  %1722 = vmatprep.mubr.msk.bf16.mxu0 %vm2034_vm0, %v2033_v1  ;;  %s1600_s10 = sshll.u32 %s190_s9, 2  ;;  %v1933_v8 = vld [vmem:[%s2386_s1 + $0x20] sm:$0xff]   ;;  %v1934_v9 = vld [vmem:[%s2386_s1 + $0x30] sm:$0xff]   ;;  %v1935_v10 = vld [vmem:[%s2386_s1 + $0x48] sm:$0xff]   ;;  %vm1077_vm4 = vcmask 64512  }
  0x16   : > { %1727 = vmatpush3.bf16.msra.mxu1 %v1928_v2  ;;  %1720 = vmatprep.subr.bf16.mxu0 %v2033_v1  ;;  %s192_s20 = scalar_lea.vmem %s2385_s0, %s1600_s10  ;;  %v1936_v11 = vld [vmem:[%s2386_s1 + $0x58] sm:$0xff]   ;;  %v1937_v12 = vld [vmem:[%s2386_s1 + $0x40] sm:$0xff]   ;;  %v1938_v13 = vld [vmem:[%s2386_s1 + $0x50] sm:$0xff]   ;;  %p1974_p13 = pneg %p1973_p12 }
  0x17   : > { %1728 = vmatprep.subr.bf16.mxu1 %v2033_v1  ;;  %1730 = vmatprep.mubr.msk.bf16.mxu1 %vm2034_vm0, %v2033_v1  ;;  %v2141_v7 = vld [vmem:[%s192_s20] sm:$0xf]  ;;  %v1939_v14 = vld [vmem:[%s2386_s1 + $0x68] sm:$0xff]   ;;  %v1940_v15 = vld [vmem:[%s2386_s1 + $0x78] sm:$0xff]   ;;  %s1655_s20 = sshll.u32 %s2082_s19, 7  ;;  %s1523_s19 = scalar_lea.sflag [#allocation3], %s186_s11 }
  0x18   : > { %v1941_v16 = vld [vmem:[%s2386_s1 + $0x60] sm:$0xff]   ;;  %v1942_v17 = vld [vmem:[%s2386_s1 + $0x70] sm:$0xff]   ;;  %v1943_v18 = vld [vmem:[%s2386_s1 + $0x88] sm:$0xff]   ;;  %s2344_s29 = scalar_lea.hbm %s2389_s4, %s1655_s20  ;;  %p1980_p2 = por %p1979_p1, %p1978_p0 }
  0x19   : > { %1721 = vmatpush3.bf16.msra.mxu0 %v1929_v3  ;;  %v1944_v19 = vld [vmem:[%s2386_s1 + $0x80] sm:$0xff]   ;;  %v1945_v20 = vld [vmem:[%s2386_s1 + $0x98] sm:$0xff]   ;;  %v1946_v21 = vld [vmem:[%s2386_s1 + $0x90] sm:$0xff]  }
  0x1a   : > { %1729 = vmatpush3.bf16.msra.mxu1 %v1930_v4  ;;  %1734 = vmatprep.subr.bf16.mxu0 %v2033_v1  ;;  %v1947_v22 = vld [vmem:[%s2386_s1 + $0xa8] sm:$0xff]   ;;  %v1948_v23 = vld [vmem:[%s2386_s1 + $0xa0] sm:$0xff]   ;;  %v1949_v24 = vld [vmem:[%s2386_s1 + $0xb8] sm:$0xff]   ;;  %p1981_p3 = pnand %p1980_p2, %p1974_p13 }
  0x1b   : > { %1742 = vmatprep.subr.bf16.mxu1 %v2033_v1  ;;  %v1950_v25 = vld [vmem:[%s2386_s1 + $0xb0] sm:$0xff]  }
  0x1c   : > { %1723 = vmatmul.mubr.msk.bf16.vlgmr.msra.gmra.mxu0 %vm264_vm1, %v2141_v7 }
  0x1d   : > { %1731 = vmatmul.mubr.msk.bf16.vlgmr.msra.gmra.mxu1 %vm264_vm1, %v2141_v7  ;;  %1735 = vmatpush3.bf16.msra.mxu0 %v1931_v5 }
  0x1e   : > { %1743 = vmatpush3.bf16.msra.mxu1 %v1932_v6  ;;  %1736 = vmatprep.subr.bf16.mxu0 %v2033_v1 }
  0x1f   : > { %1744 = vmatprep.subr.bf16.mxu1 %v2033_v1  ;;  %1738 = vmatprep.mubr.msk.bf16.mxu0 %vm2034_vm0, %v2033_v1 }
  0x20   : > { %1746 = vmatprep.mubr.msk.bf16.mxu1 %vm2034_vm0, %v2033_v1 }
  0x21   : > { %1737 = vmatpush3.bf16.msra.mxu0 %v1933_v8 }
  0x22   : > { %1745 = vmatpush3.bf16.msra.mxu1 %v1934_v9  ;;  %1750 = vmatprep.subr.bf16.mxu0 %v2033_v1 }
  0x23   : > { %1758 = vmatprep.subr.bf16.mxu1 %v2033_v1 }
  0x24   : > { %1739 = vmatmul.mubr.msk.bf16.vlgmr.msra.gmra.mxu0 %vm264_vm1, %v2141_v7 }
  0x25   : > { %1747 = vmatmul.mubr.msk.bf16.vlgmr.msra.gmra.mxu1 %vm264_vm1, %v2141_v7  ;;  %1751 = vmatpush3.bf16.msra.mxu0 %v1935_v10 }
  0x26   : > { %1759 = vmatpush3.bf16.msra.mxu1 %v1936_v11  ;;  %1752 = vmatprep.subr.bf16.mxu0 %v2033_v1 }
  0x27   : > { %1760 = vmatprep.subr.bf16.mxu1 %v2033_v1  ;;  %1754 = vmatprep.mubr.msk.bf16.mxu0 %vm2034_vm0, %v2033_v1 }
  0x28   : > { %1762 = vmatprep.mubr.msk.bf16.mxu1 %vm2034_vm0, %v2033_v1 }
  0x29   : > { %1753 = vmatpush3.bf16.msra.mxu0 %v1937_v12 }
  0x2a   : > { %1761 = vmatpush3.bf16.msra.mxu1 %v1938_v13  ;;  %1766 = vmatprep.subr.bf16.mxu0 %v2033_v1 }
  0x2b   : > { %1774 = vmatprep.subr.bf16.mxu1 %v2033_v1 }
  0x2c   : > { %1755 = vmatmul.mubr.msk.bf16.vlgmr.msra.gmra.mxu0 %vm264_vm1, %v2141_v7 }
  0x2d   : > { %1763 = vmatmul.mubr.msk.bf16.vlgmr.msra.gmra.mxu1 %vm264_vm1, %v2141_v7  ;;  %1767 = vmatpush3.bf16.msra.mxu0 %v1939_v14 }
  0x2e   : > { %1775 = vmatpush3.bf16.msra.mxu1 %v1940_v15  ;;  %1768 = vmatprep.subr.bf16.mxu0 %v2033_v1 }
  0x2f   : > { %1776 = vmatprep.subr.bf16.mxu1 %v2033_v1  ;;  %1770 = vmatprep.mubr.msk.bf16.mxu0 %vm2034_vm0, %v2033_v1 }
  0x30   : > { %1778 = vmatprep.mubr.msk.bf16.mxu1 %vm2034_vm0, %v2033_v1 }
  0x31   : > { %1769 = vmatpush3.bf16.msra.mxu0 %v1941_v16 }
  0x32   : > { %1777 = vmatpush3.bf16.msra.mxu1 %v1942_v17  ;;  %1782 = vmatprep.subr.bf16.mxu0 %v2033_v1 }
  0x33   : > { %1790 = vmatprep.subr.bf16.mxu1 %v2033_v1 }
  0x34   : > { %1771 = vmatmul.mubr.msk.bf16.vlgmr.msra.gmra.mxu0 %vm264_vm1, %v2141_v7 }
  0x35   : > { %1779 = vmatmul.mubr.msk.bf16.vlgmr.msra.gmra.mxu1 %vm264_vm1, %v2141_v7  ;;  %1783 = vmatpush3.bf16.msra.mxu0 %v1943_v18 }
  0x36   : > { %1784 = vmatprep.subr.bf16.mxu0 %v2033_v1  ;;  %1786 = vmatprep.mubr.msk.bf16.mxu0 %vm2034_vm0, %v2033_v1 }
  0x37   : > { %1794 = vmatprep.mubr.msk.bf16.mxu1 %vm2034_vm0, %v2033_v1  ;;  %1791 = vmatpush3.bf16.msra.mxu1 %v1945_v20 }
  0x38   : > { %1792 = vmatprep.subr.bf16.mxu1 %v2033_v1 }
  0x39   : > { %1785 = vmatpush3.bf16.msra.mxu0 %v1944_v19 }
  0x3a   : > { %1798 = vmatprep.subr.bf16.mxu0 %v2033_v1 }
  0x3b   : > { %1793 = vmatpush3.bf16.msra.mxu1 %v1946_v21 }
  0x3c   : > { %1787 = vmatmul.mubr.msk.bf16.vlgmr.msra.gmra.mxu0 %vm264_vm1, %v2141_v7  ;;  %1806 = vmatprep.subr.bf16.mxu1 %v2033_v1 }
  0x3d   : > { %1799 = vmatpush3.bf16.msra.mxu0 %v1947_v22  ;;  %1802 = vmatprep.mubr.msk.bf16.mxu0 %vm2034_vm0, %v2033_v1 }
  0x3e   : > { %1800 = vmatprep.subr.bf16.mxu0 %v2033_v1  ;;  %1795 = vmatmul.mubr.msk.bf16.vlgmr.msra.gmra.mxu1 %vm264_vm1, %v2141_v7 }
  0x3f   : > { %1807 = vmatpush3.bf16.msra.mxu1 %v1949_v24  ;;  %1810 = vmatprep.mubr.msk.bf16.mxu1 %vm2034_vm0, %v2033_v1 }
  0x40   : > { %1808 = vmatprep.subr.bf16.mxu1 %v2033_v1 }
  0x41   : > { %1801 = vmatpush3.bf16.msra.mxu0 %v1948_v23 }
  0x42   : > { %1814 = vmatprep.subr.bf16.mxu0 %v2033_v1 }
  0x43   : > { %1809 = vmatpush3.bf16.msra.mxu1 %v1950_v25 }
  0x44   : > { %1803 = vmatmul.mubr.msk.bf16.vlgmr.msra.gmra.mxu0 %vm264_vm1, %v2141_v7  ;;  %1820 = vmatprep.subr.bf16.mxu1 %v2033_v1 }
  0x45   : > { %1816 = vmatprep.mubr.msk.bf16.mxu0 %vm2034_vm0, %v2033_v1 }
  0x46   : > { %1811 = vmatmul.mubr.msk.bf16.vlgmr.msra.gmra.mxu1 %vm264_vm1, %v2141_v7 }
  0x47   : > { %1822 = vmatprep.mubr.msk.bf16.mxu1 %vm2034_vm0, %v2033_v1 }
  0xdc   : > { %v302_v26 = vpop.f32.mrf.mxu0 }
  0xdd   : > { %v354_v27 = vpop.f32.mrf.mxu1  ;;  %v880_v55 = vpack.c.bf16 %v302_v26, %v302_v26 }
  0xde   : > { %v1724_v28 = vpop.f32.mrf.mxu0  ;;  %v881_v58 = vpack.c.bf16 %v354_v27, %v354_v27 }
  0xdf   : > { %v1732_v29 = vpop.f32.mrf.mxu1 }
  0xe0   : > { %v305_v30 = vpop.f32.mrf.mxu0 }
  0xe1   : > { %v357_v31 = vpop.f32.mrf.mxu1 }
  0xe2   : > { %v1725_v32 = vpop.f32.mrf.mxu0 }
  0xe3   : > { %v1733_v33 = vpop.f32.mrf.mxu1 }
  0xe4   : > { %v406_v34 = vpop.f32.mrf.mxu0 }
  0xe5   : > { %v458_v35 = vpop.f32.mrf.mxu1  ;;  %v882_v5 = vpack.c.bf16 %v406_v34, %v406_v34 }
  0xe6   : > { %v1740_v36 = vpop.f32.mrf.mxu0  ;;  %v883_v6 = vpack.c.bf16 %v458_v35, %v458_v35 }
  0xe7   : > { %v1748_v37 = vpop.f32.mrf.mxu1 }
  0xe8   : > { %v409_v38 = vpop.f32.mrf.mxu0 }
  0xe9   : > { %v461_v39 = vpop.f32.mrf.mxu1 }
  0xea   : > { %v1741_v40 = vpop.f32.mrf.mxu0 }
  0xeb   : > { %v1749_v41 = vpop.f32.mrf.mxu1 }
  0xec   : > { %v510_v42 = vpop.f32.mrf.mxu0 }
  0xed   : > { %v884_v43 = vpack.c.bf16 %v510_v42, %v510_v42  ;;  %v562_v44 = vpop.f32.mrf.mxu1 }
  0xee   : > { %v885_v45 = vpack.c.bf16 %v562_v44, %v562_v44  ;;  %v1756_v46 = vpop.f32.mrf.mxu0 }
  0xef   : > { %v897_v47 = vsel %vm892_vm2, %v884_v43, 0  ;;  %v1764_v48 = vpop.f32.mrf.mxu1 }
  0xf0   : > { %v943_v49 = vsel %vm892_vm2, %v885_v45, 0  ;;  %v513_v50 = vpop.f32.mrf.mxu0  ;;  %1815 = vmatpush3.bf16.xpose.msra.mxu0 %v897_v47 }
  0xf1   : > { %v565_v51 = vpop.f32.mrf.mxu1  ;;  %1821 = vmatpush3.bf16.xpose.msra.mxu1 %v943_v49  ;;  %1826 = vmatprep.subr.bf16.mxu0 %v2033_v1 }
  0xf2   : > { %v1757_v52 = vpop.f32.mrf.mxu0  ;;  %1832 = vmatprep.subr.bf16.mxu1 %v2033_v1 }
  0xf3   : > { %v1765_v53 = vpop.f32.mrf.mxu1 }
  0xf4   : > { %v614_v54 = vpop.f32.mrf.mxu0 }
  0xf5   : > { %v886_v56 = vpack.c.bf16 %v614_v54, %v614_v54  ;;  %v666_v57 = vpop.f32.mrf.mxu1 }
  0xf6   : > { %v887_v59 = vpack.c.bf16 %v666_v57, %v666_v57  ;;  %v1772_v60 = vpop.f32.mrf.mxu0 }
  0xf7   : > { %v989_v61 = vsel %vm892_vm2, %v886_v56, 0  ;;  %v1780_v62 = vpop.f32.mrf.mxu1  ;;  %1817 = vmatmul.mubr.msk.bf16.vlgmr.msra.gmra.mxu0 %vm892_vm2, %v880_v55 }
  0xf8   : > { %v1035_v63 = vsel %vm892_vm2, %v887_v59, 0  ;;  %1823 = vmatmul.mubr.msk.bf16.vlgmr.msra.gmra.mxu1 %vm892_vm2, %v881_v58  ;;  %v617_v0 = vpop.f32.mrf.mxu0  ;;  %1827 = vmatpush3.bf16.xpose.msra.mxu0 %v989_v61 }
  0xf9   : > { %v669_v2 = vpop.f32.mrf.mxu1  ;;  %1833 = vmatpush3.bf16.xpose.msra.mxu1 %v1035_v63  ;;  %1828 = vmatprep.mubr.msk.bf16.mxu0 %vm2034_vm0, %v2033_v1 }
  0xfa   : > { %v1773_v3 = vpop.f32.mrf.mxu0  ;;  %1834 = vmatprep.mubr.msk.bf16.mxu1 %vm2034_vm0, %v2033_v1  ;;  %1838 = vmatprep.subr.bf16.mxu0 %v2033_v1 }
  0xfb   : > { %v1781_v4 = vpop.f32.mrf.mxu1  ;;  %1844 = vmatprep.subr.bf16.mxu1 %v2033_v1 }
  0xfc   : > { %v718_v7 = vpop.f32.mrf.mxu0 }
  0xfd   : > { %v888_v8 = vpack.c.bf16 %v718_v7, %v718_v7 }
  0xfe   : > { %v1788_v9 = vpop.f32.mrf.mxu0  ;;  %v770_v12 = vpop.f32.mrf.mxu1 }
  0xff   : > { %1829 = vmatmul.mubr.msk.bf16.vlgmr.msra.gmra.mxu0 %vm892_vm2, %v882_v5  ;;  %v1123_v10 = vsel %vm1121_vm3, %v888_v8, 0  ;;  %v889_v13 = vpack.c.bf16 %v770_v12, %v770_v12  ;;  %v1951_v12 = vld [vmem:[%s2387_s2] sm:$0xff]  }
 0x100   : > { %1835 = vmatmul.mubr.msk.bf16.vlgmr.msra.gmra.mxu1 %vm892_vm2, %v883_v6  ;;  %1840 = vmatprep.mubr.msk.bf16.mxu0 %vm2034_vm0, %v2033_v1  ;;  %v721_v11 = vpop.f32.mrf.mxu0  ;;  %v1796_v15 = vpop.f32.mrf.mxu1 }
 0x101   : > { %1846 = vmatprep.mubr.msk.bf16.mxu1 %vm2034_vm0, %v2033_v1  ;;  %1839 = vmatpush3.bf16.msra.mxu0 %v1123_v10  ;;  %v1169_v16 = vsel %vm1121_vm3, %v889_v13, 0  ;;  %v1952_v13 = vld [vmem:[%s2387_s2 + $0x8] sm:$0xff]  }
 0x102   : > { %1850 = vmatprep.subr.bf16.mxu0 %v2033_v1  ;;  %v1789_v14 = vpop.f32.mrf.mxu0  ;;  %v773_v17 = vpop.f32.mrf.mxu1  ;;  %1845 = vmatpush3.bf16.msra.mxu1 %v1169_v16 }
 0x103   : > { %1856 = vmatprep.subr.bf16.mxu1 %v2033_v1 }
 0x104   : > { %v822_v18 = vpop.f32.mrf.mxu0  ;;  %v1797_v20 = vpop.f32.mrf.mxu1 }
 0x105   : > { %v890_v19 = vpack.c.bf16 %v822_v18, %v822_v18 }
 0x106   : > { %v1804_v21 = vpop.f32.mrf.mxu0  ;;  %v874_v24 = vpop.f32.mrf.mxu1 }
 0x107   : > { %v1215_v22 = vsel %vm1121_vm3, %v890_v19, 0  ;;  %v891_v25 = vpack.c.bf16 %v874_v24, %v874_v24 }
 0x108   : > { %v825_v23 = vpop.f32.mrf.mxu0  ;;  %v1812_v27 = vpop.f32.mrf.mxu1 }
 0x109   : > { %v1261_v28 = vsel %vm1121_vm3, %v891_v25, 0 }
 0x10a   : > { %v1805_v26 = vpop.f32.mrf.mxu0  ;;  %v877_v29 = vpop.f32.mrf.mxu1 }
 0x10c   : > { %v1813_v30 = vpop.f32.mrf.mxu1 }
 0x10d   : > { %v1954_v30 = vld [vmem:[%s2387_s2 + $0x18] sm:$0xff]  }
 0x1b7   : > { %v933_v31 = vpop.f32.mrf.mxu0 }
 0x1b8   : > { %v979_v32 = vpop.f32.mrf.mxu1  ;;  %v1078_v33 = vsel %vm1077_vm4, %v933_v31, -inf }
 0x1b9   : > { %1079 = vmax.xlane.f32.xlu0 %v1078_v33  ;;  %v1818_v34 = vpop.f32.mrf.mxu0  ;;  %v1081_v38 = vsel %vm1077_vm4, %v979_v32, -inf }
 0x1ba   : > { %v1824_v35 = vpop.f32.mrf.mxu1 }
 0x1bb   : > { %v936_v36 = vpop.f32.mrf.mxu0 }
 0x1bc   : > { %v982_v37 = vpop.f32.mrf.mxu1 }
 0x1bd   : > { %1082 = vmax.xlane.f32.xlu0 %v1081_v38  ;;  %v1819_v39 = vpop.f32.mrf.mxu0 }
 0x1be   : > { %v1825_v40 = vpop.f32.mrf.mxu1 }
 0x1bf   : > { %v1025_v41 = vpop.f32.mrf.mxu0 }
 0x1c0   : > { %v1071_v42 = vpop.f32.mrf.mxu1  ;;  %v1084_v43 = vsel %vm1077_vm4, %v1025_v41, -inf }
 0x1c1   : > { %1085 = vmax.xlane.f32.xlu1 %v1084_v43  ;;  %v1830_v44 = vpop.f32.mrf.mxu0  ;;  %v1087_v48 = vsel %vm1077_vm4, %v1071_v42, -inf }
 0x1c2   : > { %v1836_v45 = vpop.f32.mrf.mxu1 }
 0x1c3   : > { %v1028_v46 = vpop.f32.mrf.mxu0 }
 0x1c4   : > { %v1074_v47 = vpop.f32.mrf.mxu1 }
 0x1c5   : > { %1088 = vmax.xlane.f32.xlu1 %v1087_v48  ;;  %v1831_v49 = vpop.f32.mrf.mxu0 }
 0x1c6   : > { %v1837_v50 = vpop.f32.mrf.mxu1 }
 0x242   : > { %v1080_v51 = vpop.xlane.xlu0 %1079 }
 0x243   : > { %v1090_v52 = vsub.f32 %v933_v31, %v1080_v51 }
 0x245   : > { %v1094_v53 = vmul.f32 1.442695, %v1090_v52 }
 0x246   : > { %v1083_v54 = vpop.xlane.xlu0 %1082 }
 0x247   : > { %1955 = vpow2.f32 %v1094_v53  ;;  %v1091_v55 = vsub.f32 %v979_v32, %v1083_v54 }
 0x249   : > { %v1096_v56 = vmul.f32 1.442695, %v1091_v55 }
 0x24a   : > { %v1086_v57 = vpop.xlane.xlu1 %1085 }
 0x24b   : > { %1957 = vpow2.f32 %v1096_v56  ;;  %v1092_v58 = vsub.f32 %v1025_v41, %v1086_v57 }
 0x24d   : > { %v1098_v59 = vmul.f32 1.442695, %v1092_v58 }
 0x24e   : > { %v1089_v60 = vpop.xlane.xlu1 %1088 }
 0x24f   : > { %1959 = vpow2.f32 %v1098_v59  ;;  %v1093_v61 = vsub.f32 %v1071_v42, %v1089_v60  ;;  %v1653_v60 = vld [vmem:[%s2388_s3] ss:$0 sm:$0xff] }
 0x251   : > { %v1100_v62 = vmul.f32 1.442695, %v1093_v61 }
 0x253   : > { %1961 = vpow2.f32 %v1100_v62 }
 0x254   : > { %v1956_v63 = vpop.eup %1955 }
 0x255   : > { %v1102_v0 = vsel %vm1077_vm4, %v1956_v63, 0.0  ;;  %v1114_v2 = vpack.c.bf16 %v1956_v63, %v1956_v63 }
 0x256   : > { %1103 = vadd.xlane.f32.xlu0 %v1102_v0 }
 0x257   : > { %1841 = vmatmul.mubr.msk.bf16.vlgmr.msra.gmra.mxu0 %vm1077_vm4, %v1114_v2 }
 0x258   : > { %v1958_v3 = vpop.eup %1957  ;;  %1851 = vmatpush3.bf16.msra.mxu0 %v1215_v22  ;;  %1852 = vmatprep.mubr.msk.bf16.mxu0 %vm2034_vm0, %v2033_v1  ;;  %v1953_v22 = vld [vmem:[%s2387_s2 + $0x10] sm:$0xff]  }
 0x259   : > { %v1105_v4 = vsel %vm1077_vm4, %v1958_v3, 0.0  ;;  %v1115_v5 = vpack.c.bf16 %v1958_v3, %v1958_v3  ;;  %1862 = vmatprep.subr.bf16.mxu0 %v2033_v1 }
 0x25a   : > { %1106 = vadd.xlane.f32.xlu1 %v1105_v4 }
 0x25b   : > { %1847 = vmatmul.mubr.msk.bf16.vlgmr.msra.gmra.mxu1 %vm1077_vm4, %v1115_v5 }
 0x25c   : > { %v1960_v6 = vpop.eup %1959  ;;  %1857 = vmatpush3.bf16.msra.mxu1 %v1261_v28  ;;  %1858 = vmatprep.mubr.msk.bf16.mxu1 %vm2034_vm0, %v2033_v1 }
 0x25d   : > { %v1108_v7 = vsel %vm1077_vm4, %v1960_v6, 0.0  ;;  %v1116_v8 = vpack.c.bf16 %v1960_v6, %v1960_v6  ;;  %1868 = vmatprep.subr.bf16.mxu1 %v2033_v1 }
 0x25e   : > { %1109 = vadd.xlane.f32.xlu0 %v1108_v7 }
 0x25f   : > { %1853 = vmatmul.mubr.msk.bf16.vlgmr.msra.gmra.mxu0 %vm1077_vm4, %v1116_v8 }
 0x260   : > { %v1962_v9 = vpop.eup %1961  ;;  %1864 = vmatprep.mubr.msk.bf16.mxu0 %vm2034_vm0, %v2033_v1  ;;  %1863 = vmatpush3.bf16.msra.mxu0 %v1951_v12 }
 0x261   : > { %v1111_v10 = vsel %vm1077_vm4, %v1962_v9, 0.0  ;;  %v1117_v11 = vpack.c.bf16 %v1962_v9, %v1962_v9  ;;  %1874 = vmatprep.subr.bf16.mxu0 %v2033_v1 }
 0x262   : > { %1112 = vadd.xlane.f32.xlu1 %v1111_v10 }
 0x263   : > { %1859 = vmatmul.mubr.msk.bf16.vlgmr.msra.gmra.mxu1 %vm1077_vm4, %v1117_v11 }
 0x264   : > { %1870 = vmatprep.mubr.msk.bf16.mxu1 %vm2034_vm0, %v2033_v1  ;;  %1869 = vmatpush3.bf16.msra.mxu1 %v1952_v13 }
 0x265   : > { %1880 = vmatprep.subr.bf16.mxu1 %v2033_v1 }
 0x2df   : > { %v1104_v14 = vpop.xlane.xlu0 %1103 }
 0x2e0   : > { %1963 = vrcp.f32 %v1104_v14 }
 0x2e3   : > { %v1107_v15 = vpop.xlane.xlu1 %1106 }
 0x2e4   : > { %1965 = vrcp.f32 %v1107_v15 }
 0x2e7   : > { %v1110_v16 = vpop.xlane.xlu0 %1109 }
 0x2e8   : > { %1967 = vrcp.f32 %v1110_v16 }
 0x2eb   : > { %v1113_v17 = vpop.xlane.xlu1 %1112 }
 0x2ec   : > { %1969 = vrcp.f32 %v1113_v17 }
 0x2ed   : > { %v1964_v18 = vpop.eup %1963 }
 0x2f1   : > { %v1966_v24 = vpop.eup %1965 }
 0x2f5   : > { %v1968_v32 = vpop.eup %1967 }
 0x2f9   : > { %v1970_v39 = vpop.eup %1969 }
 0x317   : > { %v1159_v19 = vpop.f32.mrf.mxu0 }
 0x318   : > { %v1307_v20 = vmul.f32 %v1964_v18, %v1159_v19 }
 0x319   : > { %v1842_v21 = vpop.f32.mrf.mxu0 }
 0x31a   : > { %v1311_v23 = vpack.c.bf16 %v1307_v20, %v1307_v20 }
 0x31b   : > { %v1162_v25 = vpop.f32.mrf.mxu0  ;;  %v1205_v26 = vpop.f32.mrf.mxu1 }
 0x31c   : > { %v1308_v27 = vmul.f32 %v1966_v24, %v1205_v26  ;;  %1865 = vmatmul.mubr.msk.bf16.vlgmr.msra.gmra.mxu0 %vm892_vm2, %v1311_v23 }
 0x31d   : > { %v1843_v28 = vpop.f32.mrf.mxu0  ;;  %v1848_v29 = vpop.f32.mrf.mxu1  ;;  %1875 = vmatpush3.bf16.msra.mxu0 %v1953_v22  ;;  %1876 = vmatprep.mubr.msk.bf16.mxu0 %vm2034_vm0, %v2033_v1 }
 0x31e   : > { %v1312_v31 = vpack.c.bf16 %v1308_v27, %v1308_v27 }
 0x31f   : > { %v1208_v33 = vpop.f32.mrf.mxu1  ;;  %v1251_v34 = vpop.f32.mrf.mxu0 }
 0x320   : > { %v1309_v35 = vmul.f32 %v1968_v32, %v1251_v34  ;;  %1871 = vmatmul.mubr.msk.bf16.vlgmr.msra.gmra.mxu1 %vm892_vm2, %v1312_v31 }
 0x321   : > { %v1849_v36 = vpop.f32.mrf.mxu1  ;;  %v1854_v37 = vpop.f32.mrf.mxu0  ;;  %1881 = vmatpush3.bf16.msra.mxu1 %v1954_v30  ;;  %1882 = vmatprep.mubr.msk.bf16.mxu1 %vm2034_vm0, %v2033_v1 }
 0x322   : > { %v1313_v38 = vpack.c.bf16 %v1309_v35, %v1309_v35 }
 0x323   : > { %v1254_v40 = vpop.f32.mrf.mxu0  ;;  %v1297_v41 = vpop.f32.mrf.mxu1 }
 0x324   : > { %v1310_v42 = vmul.f32 %v1970_v39, %v1297_v41  ;;  %1877 = vmatmul.mubr.msk.bf16.vlgmr.msra.gmra.mxu0 %vm892_vm2, %v1313_v38 }
 0x325   : > { %v1855_v43 = vpop.f32.mrf.mxu0  ;;  %v1860_v44 = vpop.f32.mrf.mxu1 }
 0x326   : > { %v1314_v45 = vpack.c.bf16 %v1310_v42, %v1310_v42 }
 0x327   : > { %v1300_v46 = vpop.f32.mrf.mxu1 }
 0x328   : > { %1883 = vmatmul.mubr.msk.bf16.vlgmr.msra.gmra.mxu1 %vm892_vm2, %v1314_v45 }
 0x329   : > { %v1861_v47 = vpop.f32.mrf.mxu1 }
 0x3dc   : > { %v1358_v48 = vpop.f32.mrf.mxu0 }
 0x3de   : > { %v1866_v49 = vpop.f32.mrf.mxu0 }
 0x3e0   : > { %v1361_v50 = vpop.f32.mrf.mxu0  ;;  %v1407_v1 = vpop.f32.mrf.mxu1 }
 0x3e1   : > { %v1511_v55 = vadd.f32 %v1407_v1, %v1358_v48 }
 0x3e2   : > { %v1867_v51 = vpop.f32.mrf.mxu0  ;;  %v1872_v52 = vpop.f32.mrf.mxu1 }
 0x3e4   : > { %v1410_v53 = vpop.f32.mrf.mxu1  ;;  %v1456_v54 = vpop.f32.mrf.mxu0 }
 0x3e5   : > { %v1512_v58 = vadd.f32 %v1511_v55, %v1456_v54 }
 0x3e6   : > { %v1873_v56 = vpop.f32.mrf.mxu1  ;;  %v1878_v57 = vpop.f32.mrf.mxu0 }
 0x3e8   : > { %v1459_v59 = vpop.f32.mrf.mxu0  ;;  %v1505_v61 = vpop.f32.mrf.mxu1 }
 0x3e9   : > { %v1513_v62 = vadd.f32 %v1512_v58, %v1505_v61 }
 0x3ea   : > { %v1879_v63 = vpop.f32.mrf.mxu0  ;;  %v1884_v0 = vpop.f32.mrf.mxu1 }
 0x3eb   : > { %v1520_v2 = vadd.f32 %v1653_v60, %v1513_v62 }
 0x3ec   : > { %v1508_v3 = vpop.f32.mrf.mxu1 }
 0x3ed   : > { %1521 = vst [vmem:[%s188_s22] sm:$0xff] %v1520_v2 }
 0x3ee   : > { %v1885_v4 = vpop.f32.mrf.mxu1 }
 0x3ef   : > { %1984 = shalt.err (!%p1981_p3)
}
 0x3f0   : > { %s1985_s8 = scalar_lea.hbm %s2344_s29, 128  ;;  %s1989_s11 = scalar_lea.hbm %s2389_s4, 256 }
 0x3f1   : > { %p1986_p4 = scmp.ne.s32.totalorder %s2344_s29, %s1985_s8  ;;  %p1990_p9 = scmp.lt.s32.totalorder %s2344_s29, %s2389_s4 }
 0x3f2   : > { %p1991_p10 = scmp.lt.s32.totalorder %s1989_s11, %s1985_s8 }
 0x3f3   : > { %p1987_p7 = pnand %p1986_p4, %p2099_p5 }
 0x3f4   : > { %p1992_p11 = por %p1991_p10, %p1990_p9 }
 0x3f5   : > { %p1988_p8 = pneg %p1987_p7 }
 0x3f7   : > { %p1993_p12 = pnand %p1992_p11, %p1988_p8 }
 0x3f9   : > { %1996 = shalt.err (!%p1993_p12)
}
 0x3fa   : > { %1886 = dma.vmem_to_hbm [thread:$0]  (%p2099_p5), %s2346_s23, 128, %s2344_s29, %s1523_s19  }
 0x3fb PF: > { %p1892_p13 = scmp.ge.s32.totalorder %s2031_s18, 2  ;;  %s1548_s14 = sand.u32 1, %s2019_s15  }
 0x3fc   : > { %s1549_s20 = scalar_lea.sflag [#allocation3], %s1548_s14 }
 0x3fd   : > { %p1889_p0 = pnand %p1892_p13, %p2103_p6 }
 0x3ff   : > { %p1890_p1 = pneg %p1889_p0 }
 0x401   : > { %2014 = dma.done.wait (%p1890_p1), %s1549_s20, 128  }
 0x402   : > { %2016 = vsyncadd (%p1890_p1), %s1549_s20, 4294967168  ;;  %p14_p2 = scmp.ge.s32.totalorder %s2086_s21, 4   ;;  %s2392_s15 = smov %s2023_s16 }
 0x403   : > { %s2393_s16 = smov %s2027_s17  ;;  %s2394_s17 = smov %s2097_s24 }
 0x404   : > { %s2395_s18 = smov %s2086_s21  ;;  %16 = sbr.rel (!%p14_p2) target bundleno = 3 (0x3), region = 71 }
 0x409   :  { %1554 = vsyncpa [#allocation3], 1 }
 0x40a   :  { %1556 = vsyncpa [#allocation3 + $0x1], 1 }

</bundles_post_ra>
